<compile_context>
chip_gen: v6e
topology: v6e:2x2x1
jax: 0.10.0
libtpu: 0.0.40
codegen_flags: <defaults>
</compile_context>

<pallas_src>
import math

import jax
import jax.numpy as jnp
from jax.experimental import pallas as pl
from jax.experimental.pallas import tpu as pltpu


# -----------------------------------------------------------------------------
# Model hyper-parameters (mirrors the PyTorch module defaults)
# -----------------------------------------------------------------------------
USER_COUNT = 100
PRODUCT_COUNT = 200
EMBEDDING_SIZE = 32
HIDDEN_LAYERS = (64, 32, 16, 8)          # first layer == 2 * embedding_size
OUTPUT_RANGE = (1, 5)
NORM_MIN = float(min(OUTPUT_RANGE))
# Faithful to the PyTorch module: norm_range = |1-5| + 1 = 5 (outputs in [1, 6]).
NORM_RANGE = float(abs(OUTPUT_RANGE[0] - OUTPUT_RANGE[1]) + 1)


def _round_up(x, m):
    return ((x + m - 1) // m) * m


# -----------------------------------------------------------------------------
# Pallas kernel: in-kernel embedding gather -> split-W1 MLP -> sigmoid -> scale
# All activations are feature-major (features, TB); the batch is on the lanes.
# -----------------------------------------------------------------------------
def ncf_kernel(uid_ref, pid_ref,          # (1, TB) int32, already modulo-hashed
               uemb_ref, pemb_ref,        # (E, U), (E, P)  VMEM-resident
               w1u_ref, w1p_ref, b1_ref,  # (32, E), (32, E), (32, 1)
               w2_ref, b2_ref,            # (16, 32), (16, 1)
               w3_ref, b3_ref,            # (8, 16),  (8, 1)
               w4_ref, b4_ref,            # (8, 1),   (1, 1)
               out_ref):                  # (1, TB)
    tb = uid_ref.shape[1]
    uid = uid_ref[...]                                        # (1, TB)
    pid = pid_ref[...]                                        # (1, TB)

    # ---- Embedding gather via one-hot matmul on the MXU --------------------
    u_rows = uemb_ref.shape[1]
    p_rows = pemb_ref.shape[1]
    u_onehot = (jax.lax.broadcasted_iota(jnp.int32, (u_rows, tb), 0)
                == uid).astype(jnp.float32)                   # (U, TB)
    p_onehot = (jax.lax.broadcasted_iota(jnp.int32, (p_rows, tb), 0)
                == pid).astype(jnp.float32)                   # (P, TB)
    uf = jnp.dot(uemb_ref[...], u_onehot,
                 preferred_element_type=jnp.float32)          # (E, TB)
    pf = jnp.dot(pemb_ref[...], p_onehot,
                 preferred_element_type=jnp.float32)          # (E, TB)

    # ---- Layer 1: split weights == concat([uf; pf]) along features ---------
    h = (jnp.dot(w1u_ref[...], uf, preferred_element_type=jnp.float32)
         + jnp.dot(w1p_ref[...], pf, preferred_element_type=jnp.float32)
         + b1_ref[...])
    h = jnp.maximum(h, 0.0)                                   # (32, TB)

    # ---- Layer 2 / 3 --------------------------------------------------------
    h = jnp.dot(w2_ref[...], h, preferred_element_type=jnp.float32) + b2_ref[...]
    h = jnp.maximum(h, 0.0)                                   # (16, TB)
    h = jnp.dot(w3_ref[...], h, preferred_element_type=jnp.float32) + b3_ref[...]
    h = jnp.maximum(h, 0.0)                                   # (8, TB)

    # ---- Final Linear(8 -> 1) on the VPU (mul + sublane reduce) -------------
    logit = jnp.sum(h * w4_ref[...], axis=0, keepdims=True) + b4_ref[...]  # (1, TB)
    y = 1.0 / (1.0 + jnp.exp(-logit))

    # Lane-dense store of the scaled rating.
    out_ref[...] = NORM_MIN + NORM_RANGE * y


# -----------------------------------------------------------------------------
# Wrapper: batch tiling, padding, weight re-layout (all tiny XLA glue)
# -----------------------------------------------------------------------------
def ncf_forward(user_id, product_id, params, *, max_tile=1024):
    user_emb = params["user_embedding"]        # (U, E)
    prod_emb = params["product_embedding"]     # (P, E)
    U, E = user_emb.shape
    P = prod_emb.shape[0]

    B = int(user_id.shape[0])
    max_tile = _round_up(max_tile, 128)
    tb = min(max_tile, _round_up(max(B, 1), 128))
    b_pad = _round_up(max(B, 1), tb)
    num_tiles = b_pad // tb

    # Modulo-hash the ids, pad to the tile grid, lay them out lane-major (1, B_pad).
    uid = jnp.pad(user_id.astype(jnp.int32) % U, (0, b_pad - B)).reshape(1, b_pad)
    pid = jnp.pad(product_id.astype(jnp.int32) % P, (0, b_pad - B)).reshape(1, b_pad)

    # Feature-major weight views (PyTorch convention: w is (out, in), b is (out,)).
    uemb_t = user_emb.T                               # (E, U)
    pemb_t = prod_emb.T                               # (E, P)
    w1 = params["w1"]                                 # (32, 64)
    w1u, w1p = w1[:, :E], w1[:, E:]                   # (32, E) each  (split == concat)
    b1 = params["b1"].reshape(-1, 1)                  # (32, 1)
    w2, b2 = params["w2"], params["b2"].reshape(-1, 1)
    w3, b3 = params["w3"], params["b3"].reshape(-1, 1)
    w4 = params["w4"].reshape(-1, 1)                  # (8, 1)
    b4 = params["b4"].reshape(1, 1)                   # (1, 1)

    operands = (uid, pid, uemb_t, pemb_t, w1u, w1p, b1, w2, b2, w3, b3, w4, b4)

    def resident(a):  # full block, constant index_map -> stays in VMEM across grid
        return pl.BlockSpec(a.shape, lambda i: (0, 0))

    in_specs = [pl.BlockSpec((1, tb), lambda i: (0, i)),   # user ids tile
                pl.BlockSpec((1, tb), lambda i: (0, i))]   # product ids tile
    in_specs += [resident(a) for a in operands[2:]]

    out = pl.pallas_call(
        ncf_kernel,
        out_shape=jax.ShapeDtypeStruct((1, b_pad), jnp.float32),
        grid=(num_tiles,),
        in_specs=in_specs,
        out_specs=pl.BlockSpec((1, tb), lambda i: (0, i)),
        compiler_params=pltpu.CompilerParams(
            dimension_semantics=("parallel",)),
    )(*operands)

    return out.reshape(b_pad)[:B].reshape(B, 1)


# -----------------------------------------------------------------------------
# Deterministic parameter init (mirrors the PyTorch _init_params)
# -----------------------------------------------------------------------------
def init_params(key,
                user_count=USER_COUNT, product_count=PRODUCT_COUNT,
                embedding_size=EMBEDDING_SIZE, hidden_layers=HIDDEN_LAYERS):
    keys = jax.random.split(key, 8)
    params = {
        "user_embedding": jax.random.uniform(
            keys[0], (user_count, embedding_size), jnp.float32, -0.05, 0.05),
        "product_embedding": jax.random.uniform(
            keys[1], (product_count, embedding_size), jnp.float32, -0.05, 0.05),
    }
    dims = list(hidden_layers) + [1]                  # 64 -> 32 -> 16 -> 8 -> 1
    for i in range(4):
        fan_in, fan_out = dims[i], dims[i + 1]
        bound = math.sqrt(6.0 / (fan_in + fan_out))   # xavier_uniform_
        params[f"w{i + 1}"] = jax.random.uniform(
            keys[2 + i], (fan_out, fan_in), jnp.float32, -bound, bound)
        params[f"b{i + 1}"] = jnp.full((fan_out,), 0.01, jnp.float32)
    return params
    # TODO(synk): dropout_rate=None in the default config, so nn.Dropout is omitted.


# -----------------------------------------------------------------------------
# Pure-JAX reference (for correctness checking only)
# -----------------------------------------------------------------------------
def ncf_reference(user_id, product_id, params):
    U = params["user_embedding"].shape[0]
    P = params["product_embedding"].shape[0]
    uf = params["user_embedding"][user_id % U]
    pf = params["product_embedding"][product_id % P]
    x = jnp.concatenate([uf, pf], axis=1)
    for i in range(1, 4):
        x = jnp.maximum(x @ params[f"w{i}"].T + params[f"b{i}"], 0.0)
    x = x @ params["w4"].T + params["b4"]
    y = 1.0 / (1.0 + jnp.exp(-x))
    return NORM_MIN + NORM_RANGE * y


# -----------------------------------------------------------------------------
if __name__ == "__main__":
    key = jax.random.PRNGKey(0)
    pkey, ukey, ikey = jax.random.split(key, 3)
    params = init_params(pkey)

    # Two configs: single-tile small batch, and a multi-tile grid (3 tiles of 128).
    for B, max_tile in ((8, 1024), (260, 128)):
        user_id = jax.random.randint(jax.random.fold_in(ukey, B), (B,), 0, 1000,
                                     dtype=jnp.int32)
        product_id = jax.random.randint(jax.random.fold_in(ikey, B), (B,), 0, 1000,
                                        dtype=jnp.int32)

        out = ncf_forward(user_id, product_id, params, max_tile=max_tile)
        jax.block_until_ready(out)

        ref = ncf_reference(user_id, product_id, params)
        assert out.shape == (B, 1)
        assert bool(jnp.all(out >= NORM_MIN)) and bool(
            jnp.all(out <= NORM_MIN + NORM_RANGE))
        err = float(jnp.max(jnp.abs(out - ref)))
        assert err < 1e-2, f"max abs error vs reference: {err}"

    print("KERNEL_OK")
</pallas_src>

<mosaic_0001>
module attributes {stable_mosaic.version = 11 : i64} {
  func.func @ncf_kernel(%arg0: i32, %arg1: memref<1x128xi32, #tpu.memory_space<vmem>>, %arg2: memref<1x128xi32, #tpu.memory_space<vmem>>, %arg3: memref<32x100xf32, #tpu.memory_space<vmem>>, %arg4: memref<32x200xf32, #tpu.memory_space<vmem>>, %arg5: memref<32x32xf32, #tpu.memory_space<vmem>>, %arg6: memref<32x32xf32, #tpu.memory_space<vmem>>, %arg7: memref<32x1xf32, #tpu.memory_space<vmem>>, %arg8: memref<16x32xf32, #tpu.memory_space<vmem>>, %arg9: memref<16x1xf32, #tpu.memory_space<vmem>>, %arg10: memref<8x16xf32, #tpu.memory_space<vmem>>, %arg11: memref<8x1xf32, #tpu.memory_space<vmem>>, %arg12: memref<8x1xf32, #tpu.memory_space<vmem>>, %arg13: memref<1x1xf32, #tpu.memory_space<vmem>>, %arg14: memref<1x128xf32, #tpu.memory_space<vmem>>) attributes {dimension_semantics = [#tpu.dimension_semantics<parallel>], iteration_bounds = array<i64: 1>, scalar_prefetch = 0 : i64, scratch_operands = 0 : i64, tpu.core_type = #tpu.core_type<tc>, window_params = [{transform_indices = @transform_0, window_bounds = array<i64: 1, 128>}, {transform_indices = @transform_1, window_bounds = array<i64: 1, 128>}, {pipeline_mode = #tpu.pipeline_mode<synchronous>, transform_indices = @transform_2, window_bounds = array<i64: 32, 100>}, {pipeline_mode = #tpu.pipeline_mode<synchronous>, transform_indices = @transform_3, window_bounds = array<i64: 32, 200>}, {pipeline_mode = #tpu.pipeline_mode<synchronous>, transform_indices = @transform_4, window_bounds = array<i64: 32, 32>}, {pipeline_mode = #tpu.pipeline_mode<synchronous>, transform_indices = @transform_5, window_bounds = array<i64: 32, 32>}, {pipeline_mode = #tpu.pipeline_mode<synchronous>, transform_indices = @transform_6, window_bounds = array<i64: 32, 1>}, {pipeline_mode = #tpu.pipeline_mode<synchronous>, transform_indices = @transform_7, window_bounds = array<i64: 16, 32>}, {pipeline_mode = #tpu.pipeline_mode<synchronous>, transform_indices = @transform_8, window_bounds = array<i64: 16, 1>}, {pipeline_mode = #tpu.pipeline_mode<synchronous>, transform_indices = @transform_9, window_bounds = array<i64: 8, 16>}, {pipeline_mode = #tpu.pipeline_mode<synchronous>, transform_indices = @transform_10, window_bounds = array<i64: 8, 1>}, {pipeline_mode = #tpu.pipeline_mode<synchronous>, transform_indices = @transform_11, window_bounds = array<i64: 8, 1>}, {pipeline_mode = #tpu.pipeline_mode<synchronous>, transform_indices = @transform_12, window_bounds = array<i64: 1, 1>}, {transform_indices = @transform_13, window_bounds = array<i64: 1, 128>}]} {
    %c0 = arith.constant 0 : index
    %c0_0 = arith.constant 0 : index
    %0 = vector.load %arg1[%c0, %c0_0] : memref<1x128xi32, #tpu.memory_space<vmem>>, vector<1x128xi32>
    %c0_1 = arith.constant 0 : index
    %c0_2 = arith.constant 0 : index
    %1 = vector.load %arg2[%c0_1, %c0_2] : memref<1x128xi32, #tpu.memory_space<vmem>>, vector<1x128xi32>
    %2 = tpu.iota {dimensions = array<i32: 0>} : vector<100x128xi32>
    %3 = vector.broadcast %0 : vector<1x128xi32> to vector<100x128xi32>
    %4 = arith.cmpi eq, %2, %3 : vector<100x128xi32>
    %5 = arith.extui %4 : vector<100x128xi1> to vector<100x128xi32>
    %6 = arith.sitofp %5 : vector<100x128xi32> to vector<100x128xf32>
    %7 = tpu.iota {dimensions = array<i32: 0>} : vector<200x128xi32>
    %8 = vector.broadcast %1 : vector<1x128xi32> to vector<200x128xi32>
    %9 = arith.cmpi eq, %7, %8 : vector<200x128xi32>
    %10 = arith.extui %9 : vector<200x128xi1> to vector<200x128xi32>
    %11 = arith.sitofp %10 : vector<200x128xi32> to vector<200x128xf32>
    %c0_3 = arith.constant 0 : index
    %c0_4 = arith.constant 0 : index
    %12 = vector.load %arg3[%c0_3, %c0_4] : memref<32x100xf32, #tpu.memory_space<vmem>>, vector<32x100xf32>
    %cst = arith.constant dense<0.000000e+00> : vector<32x128xf32>
    %13 = tpu.matmul %12, %6, %cst {dimension_numbers = #tpu.dot_dimension_numbers<[1], [0], [0], [1], [0, 0, 1, 1], [], []>} : vector<32x100xf32>, vector<100x128xf32>, vector<32x128xf32> -> vector<32x128xf32>
    %c0_5 = arith.constant 0 : index
    %c0_6 = arith.constant 0 : index
    %14 = vector.load %arg4[%c0_5, %c0_6] : memref<32x200xf32, #tpu.memory_space<vmem>>, vector<32x200xf32>
    %cst_7 = arith.constant dense<0.000000e+00> : vector<32x128xf32>
    %15 = tpu.matmul %14, %11, %cst_7 {dimension_numbers = #tpu.dot_dimension_numbers<[1], [0], [0], [1], [0, 0, 1, 1], [], []>} : vector<32x200xf32>, vector<200x128xf32>, vector<32x128xf32> -> vector<32x128xf32>
    %c0_8 = arith.constant 0 : index
    %c0_9 = arith.constant 0 : index
    %16 = vector.load %arg5[%c0_8, %c0_9] : memref<32x32xf32, #tpu.memory_space<vmem>>, vector<32x32xf32>
    %cst_10 = arith.constant dense<0.000000e+00> : vector<32x128xf32>
    %17 = tpu.matmul %16, %13, %cst_10 {dimension_numbers = #tpu.dot_dimension_numbers<[1], [0], [0], [1], [0, 0, 1, 1], [], []>} : vector<32x32xf32>, vector<32x128xf32>, vector<32x128xf32> -> vector<32x128xf32>
    %c0_11 = arith.constant 0 : index
    %c0_12 = arith.constant 0 : index
    %18 = vector.load %arg6[%c0_11, %c0_12] : memref<32x32xf32, #tpu.memory_space<vmem>>, vector<32x32xf32>
    %cst_13 = arith.constant dense<0.000000e+00> : vector<32x128xf32>
    %19 = tpu.matmul %18, %15, %cst_13 {dimension_numbers = #tpu.dot_dimension_numbers<[1], [0], [0], [1], [0, 0, 1, 1], [], []>} : vector<32x32xf32>, vector<32x128xf32>, vector<32x128xf32> -> vector<32x128xf32>
    %20 = arith.addf %17, %19 : vector<32x128xf32>
    %c0_14 = arith.constant 0 : index
    %c0_15 = arith.constant 0 : index
    %21 = vector.load %arg7[%c0_14, %c0_15] : memref<32x1xf32, #tpu.memory_space<vmem>>, vector<32x1xf32>
    %22 = vector.broadcast %21 : vector<32x1xf32> to vector<32x128xf32>
    %23 = arith.addf %20, %22 : vector<32x128xf32>
    %cst_16 = arith.constant 0.000000e+00 : f32
    %24 = vector.broadcast %cst_16 : f32 to vector<32x128xf32>
    %25 = arith.maximumf %23, %24 : vector<32x128xf32>
    %c0_17 = arith.constant 0 : index
    %c0_18 = arith.constant 0 : index
    %26 = vector.load %arg8[%c0_17, %c0_18] : memref<16x32xf32, #tpu.memory_space<vmem>>, vector<16x32xf32>
    %cst_19 = arith.constant dense<0.000000e+00> : vector<16x128xf32>
    %27 = tpu.matmul %26, %25, %cst_19 {dimension_numbers = #tpu.dot_dimension_numbers<[1], [0], [0], [1], [0, 0, 1, 1], [], []>} : vector<16x32xf32>, vector<32x128xf32>, vector<16x128xf32> -> vector<16x128xf32>
    %c0_20 = arith.constant 0 : index
    %c0_21 = arith.constant 0 : index
    %28 = vector.load %arg9[%c0_20, %c0_21] : memref<16x1xf32, #tpu.memory_space<vmem>>, vector<16x1xf32>
    %29 = vector.broadcast %28 : vector<16x1xf32> to vector<16x128xf32>
    %30 = arith.addf %27, %29 : vector<16x128xf32>
    %cst_22 = arith.constant 0.000000e+00 : f32
    %31 = vector.broadcast %cst_22 : f32 to vector<16x128xf32>
    %32 = arith.maximumf %30, %31 : vector<16x128xf32>
    %c0_23 = arith.constant 0 : index
    %c0_24 = arith.constant 0 : index
    %33 = vector.load %arg10[%c0_23, %c0_24] : memref<8x16xf32, #tpu.memory_space<vmem>>, vector<8x16xf32>
    %cst_25 = arith.constant dense<0.000000e+00> : vector<8x128xf32>
    %34 = tpu.matmul %33, %32, %cst_25 {dimension_numbers = #tpu.dot_dimension_numbers<[1], [0], [0], [1], [0, 0, 1, 1], [], []>} : vector<8x16xf32>, vector<16x128xf32>, vector<8x128xf32> -> vector<8x128xf32>
    %c0_26 = arith.constant 0 : index
    %c0_27 = arith.constant 0 : index
    %35 = vector.load %arg11[%c0_26, %c0_27] : memref<8x1xf32, #tpu.memory_space<vmem>>, vector<8x1xf32>
    %36 = vector.broadcast %35 : vector<8x1xf32> to vector<8x128xf32>
    %37 = arith.addf %34, %36 : vector<8x128xf32>
    %cst_28 = arith.constant 0.000000e+00 : f32
    %38 = vector.broadcast %cst_28 : f32 to vector<8x128xf32>
    %39 = arith.maximumf %37, %38 : vector<8x128xf32>
    %c0_29 = arith.constant 0 : index
    %c0_30 = arith.constant 0 : index
    %40 = vector.load %arg12[%c0_29, %c0_30] : memref<8x1xf32, #tpu.memory_space<vmem>>, vector<8x1xf32>
    %41 = vector.broadcast %40 : vector<8x1xf32> to vector<8x128xf32>
    %42 = arith.mulf %39, %41 : vector<8x128xf32>
    %cst_31 = arith.constant dense<0.000000e+00> : vector<128xf32>
    %43 = vector.multi_reduction <add>, %42, %cst_31 [0] : vector<8x128xf32> to vector<128xf32>
    %44 = vector.shape_cast %43 : vector<128xf32> to vector<1x128xf32>
    %c0_32 = arith.constant 0 : index
    %c0_33 = arith.constant 0 : index
    %45 = vector.load %arg13[%c0_32, %c0_33] : memref<1x1xf32, #tpu.memory_space<vmem>>, vector<1x1xf32>
    %46 = vector.broadcast %45 : vector<1x1xf32> to vector<1x128xf32>
    %47 = arith.addf %44, %46 : vector<1x128xf32>
    %cst_34 = arith.constant 0.000000e+00 : f32
    %48 = vector.broadcast %cst_34 : f32 to vector<1x128xf32>
    %49 = arith.subf %48, %47 : vector<1x128xf32>
    %50 = math.exp %49 : vector<1x128xf32>
    %cst_35 = arith.constant 1.000000e+00 : f32
    %51 = vector.broadcast %cst_35 : f32 to vector<1x128xf32>
    %52 = arith.addf %51, %50 : vector<1x128xf32>
    %cst_36 = arith.constant 1.000000e+00 : f32
    %53 = vector.broadcast %cst_36 : f32 to vector<1x128xf32>
    %54 = arith.divf %53, %52 : vector<1x128xf32>
    %cst_37 = arith.constant 5.000000e+00 : f32
    %55 = vector.broadcast %cst_37 : f32 to vector<1x128xf32>
    %56 = arith.mulf %55, %54 : vector<1x128xf32>
    %cst_38 = arith.constant 1.000000e+00 : f32
    %57 = vector.broadcast %cst_38 : f32 to vector<1x128xf32>
    %58 = arith.addf %57, %56 : vector<1x128xf32>
    %c0_39 = arith.constant 0 : index
    %c0_40 = arith.constant 0 : index
    %59 = vector.load %arg14[%c0_39, %c0_40] : memref<1x128xf32, #tpu.memory_space<vmem>>, vector<1x128xf32>
    tpu.vector_store %arg14[%c0_39, %c0_40], %58 {strides = array<i32>} : memref<1x128xf32, #tpu.memory_space<vmem>>, vector<1x128xf32>,
    return
  }
  func.func @transform_0(%arg0: i32) -> (i32, i32) {
    %c0_i32 = arith.constant 0 : i32
    %c0_i32_0 = arith.constant 0 : i32
    return %c0_i32, %arg0 : i32, i32
  }
  func.func @transform_1(%arg0: i32) -> (i32, i32) {
    %c0_i32 = arith.constant 0 : i32
    %c0_i32_0 = arith.constant 0 : i32
    return %c0_i32, %arg0 : i32, i32
  }
  func.func @transform_2(%arg0: i32) -> (i32, i32) {
    %c0_i32 = arith.constant 0 : i32
    %c0_i32_0 = arith.constant 0 : i32
    %c0_i32_1 = arith.constant 0 : i32
    return %c0_i32, %c0_i32_0 : i32, i32
  }
  func.func @transform_3(%arg0: i32) -> (i32, i32) {
    %c0_i32 = arith.constant 0 : i32
    %c0_i32_0 = arith.constant 0 : i32
    %c0_i32_1 = arith.constant 0 : i32
    return %c0_i32, %c0_i32_0 : i32, i32
  }
  func.func @transform_4(%arg0: i32) -> (i32, i32) {
    %c0_i32 = arith.constant 0 : i32
    %c0_i32_0 = arith.constant 0 : i32
    %c0_i32_1 = arith.constant 0 : i32
    return %c0_i32, %c0_i32_0 : i32, i32
  }
  func.func @transform_5(%arg0: i32) -> (i32, i32) {
    %c0_i32 = arith.constant 0 : i32
    %c0_i32_0 = arith.constant 0 : i32
    %c0_i32_1 = arith.constant 0 : i32
    return %c0_i32, %c0_i32_0 : i32, i32
  }
  func.func @transform_6(%arg0: i32) -> (i32, i32) {
    %c0_i32 = arith.constant 0 : i32
    %c0_i32_0 = arith.constant 0 : i32
    %c0_i32_1 = arith.constant 0 : i32
    return %c0_i32, %c0_i32_0 : i32, i32
  }
  func.func @transform_7(%arg0: i32) -> (i32, i32) {
    %c0_i32 = arith.constant 0 : i32
    %c0_i32_0 = arith.constant 0 : i32
    %c0_i32_1 = arith.constant 0 : i32
    return %c0_i32, %c0_i32_0 : i32, i32
  }
  func.func @transform_8(%arg0: i32) -> (i32, i32) {
    %c0_i32 = arith.constant 0 : i32
    %c0_i32_0 = arith.constant 0 : i32
    %c0_i32_1 = arith.constant 0 : i32
    return %c0_i32, %c0_i32_0 : i32, i32
  }
  func.func @transform_9(%arg0: i32) -> (i32, i32) {
    %c0_i32 = arith.constant 0 : i32
    %c0_i32_0 = arith.constant 0 : i32
    %c0_i32_1 = arith.constant 0 : i32
    return %c0_i32, %c0_i32_0 : i32, i32
  }
  func.func @transform_10(%arg0: i32) -> (i32, i32) {
    %c0_i32 = arith.constant 0 : i32
    %c0_i32_0 = arith.constant 0 : i32
    %c0_i32_1 = arith.constant 0 : i32
    return %c0_i32, %c0_i32_0 : i32, i32
  }
  func.func @transform_11(%arg0: i32) -> (i32, i32) {
    %c0_i32 = arith.constant 0 : i32
    %c0_i32_0 = arith.constant 0 : i32
    %c0_i32_1 = arith.constant 0 : i32
    return %c0_i32, %c0_i32_0 : i32, i32
  }
  func.func @transform_12(%arg0: i32) -> (i32, i32) {
    %c0_i32 = arith.constant 0 : i32
    %c0_i32_0 = arith.constant 0 : i32
    %c0_i32_1 = arith.constant 0 : i32
    return %c0_i32, %c0_i32_0 : i32, i32
  }
  func.func @transform_13(%arg0: i32) -> (i32, i32) {
    %c0_i32 = arith.constant 0 : i32
    %c0_i32_0 = arith.constant 0 : i32
    return %c0_i32, %arg0 : i32, i32
  }
}

</mosaic_0001>

<bundles_post_ra>
// kernel: tpu_custom_call.1
= control target key start
LH: loop header
LB: loop body
LE: loop exit
PB: predicated region body
PF: predicated region fallthrough
CT: control target
= control target key end

     0   :  { %s1675_s0 = inlined_call_operand.hbm [shape: s32[1,128], index: 0, kind: input, shape index: {}]   ;;  %s1676_s1 = inlined_call_operand.hbm [shape: s32[1,128], index: 1, kind: input, shape index: {}]   ;;  %s1677_s2 = inlined_call_operand.hbm [shape: f32[32,100], index: 2, kind: input, shape index: {}]   ;;  %s1678_s3 = inlined_call_operand.vmem [shape: f32[32,200], index: 3, kind: input, shape index: {}]   ;;  %s1679_s4 = inlined_call_operand.hbm [shape: f32[32,32], index: 4, kind: input, shape index: {}]   ;;  %s1680_s5 = inlined_call_operand.hbm [shape: f32[32,32], index: 5, kind: input, shape index: {}]   ;;  %s1681_s6 = inlined_call_operand.vmem [shape: f32[32,1], index: 6, kind: input, shape index: {}]   ;;  %s1682_s7 = inlined_call_operand.vmem [shape: f32[16,32], index: 7, kind: input, shape index: {}]   ;;  %s1683_s8 = inlined_call_operand.vmem [shape: f32[16,1], index: 8, kind: input, shape index: {}]   ;;  %s1684_s9 = inlined_call_operand.hbm [shape: f32[8,16], index: 9, kind: input, shape index: {}]   ;;  %s1685_s10 = inlined_call_operand.vmem [shape: f32[8,1], index: 10, kind: input, shape index: {}]   ;;  %s1686_s11 = inlined_call_operand.vmem [shape: f32[8,1], index: 11, kind: input, shape index: {}]   ;;  %s1687_s12 = inlined_call_operand.<no memory space> [shape: f32[1,1], index: 12, kind: input, shape index: {}]   ;;  %s1688_s13 = inlined_call_operand.hbm [shape: f32[1,128], index: 13, kind: output, shape index: {}]  }
   0x1   :  { %v18_v0 = vstv %s1687_s12 }
   0x2   :  { %19 = vst [vmem:[#allocation2] sm:$0x1] %v18_v0 }
   0x3   :  { %20 = vsyncpa [#allocation4], 0 }
   0x4   :  { %21 = vsyncpa [#allocation7], 0 }
   0x5   :  { %22 = vsyncpa [#allocation10], 0 }
   0x6   :  { %23 = vsyncpa [#allocation13], 0 }
   0x7   :  { %24 = vsyncpa [#allocation5], 0  ;;  %s1336_s27 = smov [#allocation6]  }
   0x8   :  { %s41_s28 = sshll.u32 %s1336_s27, 4  ;;  %s42_s28 = int_to_ptr.vmem [resolvable:$true] %s41_s28 }
   0x9   :  { %s1194_s29 = scalar_lea.vmem %s42_s28, 16  ;;  %s1198_s30 = scalar_lea.vmem %s42_s28, 32 }
   0xa   :  { %p1195_p0 = scmp.ne.s32.totalorder %s42_s28, %s1194_s29  ;;  %p1199_p1 = scmp.lt.s32.totalorder %s42_s28, %s42_s28 }
   0xb   :  { %p1200_p2 = scmp.lt.s32.totalorder %s1198_s30, %s1194_s29 }
   0xd   :  { %p1201_p3 = por %p1200_p2, %p1199_p1 }
   0xf   :  { %p1202_p4 = pnand %p1201_p3, %p1195_p0 }
  0x11   :  { %1205 = shalt.err (!%p1202_p4)
}
  0x12   :  { %44 = dma.hbm_to_vmem [thread:$0]  %s1676_s1, 16, %s42_s28, [#allocation7]  }
  0x13   :  { %s1337_s12 = smov [#allocation9]   ;;  %s1338_s17 = smov [#allocation3]  }
  0x14   :  { %s64_s16 = sshll.u32 %s1337_s12, 4  ;;  %s31_s18 = sshll.u32 %s1338_s17, 4  ;;  %s65_s16 = int_to_ptr.vmem [resolvable:$true] %s64_s16  ;;  %s32_s18 = int_to_ptr.vmem [resolvable:$true] %s31_s18 }
  0x15   :  { %s1214_s19 = scalar_lea.vmem %s65_s16, 512  ;;  %p1219_p6 = scmp.lt.s32.totalorder %s65_s16, %s65_s16 }
  0x16   :  { %p1215_p5 = scmp.ne.s32.totalorder %s65_s16, %s1214_s19  ;;  %p1220_p7 = scmp.lt.s32.totalorder %s1214_s19, %s1214_s19 }
  0x18   :  { %p1221_p8 = por %p1220_p7, %p1219_p6 }
  0x1a   :  { %p1222_p9 = pnand %p1221_p8, %p1215_p5 }
  0x1c   :  { %1225 = shalt.err (!%p1222_p9)
}
  0x1d   :  { %s1339_s20 = smov 128   ;;  %s1340_s21 = smov 8  }
  0x1e   :  { %70 = dma.hbm_to_vmem [thread:$0]  %s1679_s4, 512, %s65_s16, [#allocation10], %s1339_s20, %s1339_s20, %s1340_s21  }
  0x1f   :  { %s1234_s1 = scalar_lea.vmem %s32_s18, 16  ;;  %s1238_s24 = scalar_lea.vmem %s32_s18, 32 }
  0x20   :  { %p1235_p10 = scmp.ne.s32.totalorder %s32_s18, %s1234_s1  ;;  %p1239_p11 = scmp.lt.s32.totalorder %s32_s18, %s32_s18 }
  0x21   :  { %p1240_p12 = scmp.lt.s32.totalorder %s1238_s24, %s1234_s1 }
  0x23   :  { %p1241_p13 = por %p1240_p12, %p1239_p11 }
  0x25   :  { %p1242_p0 = pnand %p1241_p13, %p1235_p10 }
  0x27   :  { %1245 = shalt.err (!%p1242_p0)
}
  0x28   :  { %34 = dma.hbm_to_vmem [thread:$0]  %s1675_s0, 16, %s32_s18, [#allocation4]  }
  0x29   :  { %s1341_s27 = smov [#allocation8]   ;;  %s1342_s29 = smov [#allocation11]  }
  0x2a   :  { %s50_s28 = sshll.u32 %s1341_s27, 4  ;;  %s76_s30 = sshll.u32 %s1342_s29, 4  ;;  %s51_s28 = int_to_ptr.vmem [resolvable:$true] %s50_s28  ;;  %s77_s30 = int_to_ptr.vmem [resolvable:$true] %s76_s30 }
  0x2b   :  { %s1254_s14 = scalar_lea.vmem %s51_s28, 512  ;;  %p1259_p2 = scmp.lt.s32.totalorder %s51_s28, %s51_s28 }
  0x2c   :  { %p1255_p1 = scmp.ne.s32.totalorder %s51_s28, %s1254_s14  ;;  %p1260_p3 = scmp.lt.s32.totalorder %s1254_s14, %s1254_s14 }
  0x2e   :  { %p1261_p4 = por %p1260_p3, %p1259_p2 }
  0x30   :  { %p1262_p5 = pnand %p1261_p4, %p1255_p1 }
  0x32   :  { %1265 = shalt.err (!%p1262_p5)
}
  0x33   :  { %56 = dma.hbm_to_vmem [thread:$0]  %s1677_s2, 512, %s51_s28, [#allocation7], %s1339_s20, %s1339_s20, %s1340_s21  }
  0x34   :  { %s1274_s0 = scalar_lea.vmem %s77_s30, 512  ;;  %p1279_p7 = scmp.lt.s32.totalorder %s77_s30, %s77_s30 }
  0x35   :  { %p1275_p6 = scmp.ne.s32.totalorder %s77_s30, %s1274_s0  ;;  %p1280_p8 = scmp.lt.s32.totalorder %s1274_s0, %s1274_s0 }
  0x37   :  { %p1281_p9 = por %p1280_p8, %p1279_p7 }
  0x39   :  { %p1282_p10 = pnand %p1281_p9, %p1275_p6 }
  0x3b   :  { %1285 = shalt.err (!%p1282_p10)
}
  0x3c   :  { %82 = dma.hbm_to_vmem [thread:$0]  %s1680_s5, 512, %s77_s30, [#allocation10], %s1339_s20, %s1339_s20, %s1340_s21  }
  0x3d   :  { %s1343_s17 = smov [#allocation12]  }
  0x3e   :  { %s95_s18 = sshll.u32 %s1343_s17, 4  ;;  %s96_s18 = int_to_ptr.vmem [resolvable:$true] %s95_s18 }
  0x3f   :  { %s1294_s19 = scalar_lea.vmem %s96_s18, 128  ;;  %p1299_p12 = scmp.lt.s32.totalorder %s96_s18, %s96_s18 }
  0x40   :  { %p1295_p11 = scmp.ne.s32.totalorder %s96_s18, %s1294_s19  ;;  %p1300_p13 = scmp.lt.s32.totalorder %s1294_s19, %s1294_s19 }
  0x42   :  { %p1301_p0 = por %p1300_p13, %p1299_p12 }
  0x44   :  { %p1302_p1 = pnand %p1301_p0, %p1295_p11 }
  0x46   :  { %1305 = shalt.err (!%p1302_p1)
}
  0x47   :  { %98 = dma.hbm_to_vmem [thread:$0]  %s1684_s9, 128, %s96_s18, [#allocation13]  }
  0x48   :  { %1326 = dma.done.wait [#allocation4], 16  }
  0x49   :  { %1327 = vsyncadd [#allocation4], 4294967280 }
  0x4a   :  { %1328 = dma.done.wait [#allocation7], 528  }
  0x4b   :  { %1329 = vsyncadd [#allocation7], 4294966768 }
  0x4c   :  { %1330 = dma.done.wait [#allocation10], 1024  }
  0x4d   :  { %1331 = vsyncadd [#allocation10], 4294966272 }
  0x4e   :  { %1332 = dma.done.wait [#allocation13], 128  }
  0x4f   :  { %1333 = vsyncadd [#allocation13], 4294967168  ;;  %v125_v1 = vlaneseq  ;;  %v1344_v2 = vmov 0.0   ;;  %v1455_v7 = vld [vmem:[#allocation6] ss:$0 sm:$0xff]  ;;  %v1345_v9 = vmov 1.0  }
  0x50   :  { %400 = vmatprep.subr.mxu1 %v1344_v2  ;;  %v1461_v10 = vld [vmem:[#allocation3] ss:$0 sm:$0xff]  ;;  %v380_v11 = vld [vmem:[%s1678_s3 + $0x8] sm:$0xff]  ;;  %vm387_vm2 = vcmask 588800   ;;  %vm277_vm4 = vcmask 818176   ;;  %vm290_vm5 = vcmask 1043456  }
  0x51   :  { %v1450_v3 = vshrl.u32 %v125_v1, 7  ;;  %v273_v13 = vld [vmem:[#allocation8] sm:$0xff]  ;;  %1032 = vmatprep.mubr.msk.f32.mxu1 %vm387_vm2, %v380_v11  ;;  %v274_v27 = vld [vmem:[#allocation8 + $0x8] sm:$0xff]  ;;  %v275_v29 = vld [vmem:[#allocation8 + $0x10] sm:$0xff]  ;;  %v1346_v46 = vmov 0  }
  0x52   :  { %1115 = vmatprep.mubr.msk.f32.mxu0 %vm277_vm4, %v273_v13  ;;  %v276_v31 = vld [vmem:[#allocation8 + $0x18] sm:$0xff]  ;;  %v381_v39 = vld [vmem:[%s1678_s3 + $0x10] sm:$0xff]  ;;  %v384_v40 = vld [vmem:[%s1678_s3 + $0x28] sm:$0xff]  ;;  %1180 = vset.pattern.permute.xlu0 %v1346_v46 }
  0x53   :  { %v184_v4 = vadd.s32 120, %v1450_v3  ;;  %v183_v5 = vadd.s32 112, %v1450_v3  ;;  %v182_v6 = vadd.s32 104, %v1450_v3  ;;  %v138_v8 = vadd.s32 96, %v1450_v3  ;;  %v379_v37 = vld [vmem:[%s1678_s3] sm:$0xff]  ;;  %v382_v38 = vld [vmem:[%s1678_s3 + $0x18] sm:$0xff]  ;;  %1181 = vset.pattern.permute.xlu1 %v1346_v46 }
  0x54   :  { %v137_v12 = vadd.s32 88, %v1450_v3  ;;  %v136_v14 = vadd.s32 80, %v1450_v3  ;;  %v135_v16 = vadd.s32 72, %v1450_v3  ;;  %v134_v17 = vadd.s32 64, %v1450_v3  ;;  %v383_v41 = vld [vmem:[%s1678_s3 + $0x20] sm:$0xff]  ;;  %v386_v42 = vld [vmem:[%s1678_s3 + $0x38] sm:$0xff] }
  0x55   :  { %vm213_vm0 = vcmp.eq.s32.totalorder %v184_v4, %v1455_v7  ;;  %vm212_vm1 = vcmp.eq.s32.totalorder %v183_v5, %v1455_v7  ;;  %vm211_vm3 = vcmp.eq.s32.totalorder %v182_v6, %v1455_v7  ;;  %vm210_vm6 = vcmp.eq.s32.totalorder %v138_v8, %v1455_v7  ;;  %v385_v43 = vld [vmem:[%s1678_s3 + $0x30] sm:$0xff]  ;;  %v489_v44 = vld [vmem:[#allocation11] sm:$0xff]  ;;  %v691_v45 = vld [vmem:[%s1681_s6 + $0x18] sm:$0xff] }
  0x56   :  { %1007 = vmatpush1.msk.msra.mxu1 %vm213_vm0, %v1345_v9  ;;  %vm155_vm7 = vcmp.eq.s32.totalorder %v138_v8, %v1461_v10  ;;  %vm154_vm8 = vcmp.eq.s32.totalorder %v137_v12, %v1461_v10  ;;  %vm209_vm9 = vcmp.eq.s32.totalorder %v137_v12, %v1455_v7  ;;  %vm153_vm10 = vcmp.eq.s32.totalorder %v136_v14, %v1461_v10  ;;  %v689_v47 = vld [vmem:[%s1681_s6 + $0x8] sm:$0xff]  ;;  %v690_v48 = vld [vmem:[%s1681_s6 + $0x10] sm:$0xff]  ;;  %v688_v49 = vld [vmem:[%s1681_s6] sm:$0xff] }
  0x57   :  { %402 = vmatprep.subr.mxu1 %v1344_v2  ;;  %v963_v15 = vsel %vm155_vm7, 1.0, %v1344_v2  ;;  %vm208_vm11 = vcmp.eq.s32.totalorder %v136_v14, %v1455_v7  ;;  %vm152_vm12 = vcmp.eq.s32.totalorder %v135_v16, %v1461_v10  ;;  %vm207_vm13 = vcmp.eq.s32.totalorder %v135_v16, %v1455_v7  ;;  %709 = vperm.xlu0 %1180, %v691_v45   ;;  %v723_v50 = vld [vmem:[%s1683_s8 + $0x8] sm:$0xff]  ;;  %v722_v51 = vld [vmem:[%s1683_s8] sm:$0xff]  ;;  %v491_v5 = vld [vmem:[#allocation11 + $0x10] sm:$0xff] }
  0x58   :  { %1008 = vmatpush1.msk.msra.mxu1 %vm212_vm1, %v1345_v9  ;;  %1089 = vmatprep.subr.msk.mxu0 %vm290_vm5, %v963_v15  ;;  %v133_v18 = vadd.s32 56, %v1450_v3  ;;  %vm151_vm14 = vcmp.eq.s32.totalorder %v134_v17, %v1461_v10  ;;  %vm206_vm15 = vcmp.eq.s32.totalorder %v134_v17, %v1455_v7  ;;  %v132_v19 = vadd.s32 48, %v1450_v3  ;;  %v818_v52 = vld [vmem:[%s1685_s10] sm:$0xff]  ;;  %v490_v4 = vld [vmem:[#allocation11 + $0x8] sm:$0xff] }
  0x59   :  { %404 = vmatprep.subr.mxu1 %v1344_v2  ;;  %1090 = vmatpush3.msk.msra.mxu0 %vm290_vm5, %v963_v15  ;;  %v131_v20 = vadd.s32 40, %v1450_v3  ;;  %v130_v21 = vadd.s32 32, %v1450_v3  ;;  %v129_v22 = vadd.s32 24, %v1450_v3  ;;  %v128_v23 = vadd.s32 16, %v1450_v3  ;;  %v899_v53 = vld [vmem:[%s1686_s11] sm:$0xff] }
  0x5a   :  { %1009 = vmatpush1.msk.msra.mxu1 %vm211_vm3, %v1345_v9  ;;  %1091 = vmatprep.subr.msk.mxu0 %vm154_vm8, %v1345_v9  ;;  %vm150_vm0 = vcmp.eq.s32.totalorder %v133_v18, %v1461_v10  ;;  %vm205_vm1 = vcmp.eq.s32.totalorder %v133_v18, %v1455_v7  ;;  %vm149_vm3 = vcmp.eq.s32.totalorder %v132_v19, %v1461_v10  ;;  %v127_v24 = vadd.s32 8, %v1450_v3  ;;  %v912_v54 = vld [vmem:[#allocation2] sm:$0x1]  ;;  %v485_v8 = vld [vmem:[#allocation9] sm:$0xff] }
  0x5b   :  { %406 = vmatprep.subr.mxu1 %v1344_v2  ;;  %1092 = vmatpush3.msk.msra.mxu0 %vm154_vm8, %v1345_v9  ;;  %vm204_vm5 = vcmp.eq.s32.totalorder %v132_v19, %v1455_v7  ;;  %vm203_vm7 = vcmp.eq.s32.totalorder %v131_v20, %v1455_v7  ;;  %vm147_vm8 = vcmp.eq.s32.totalorder %v130_v21, %v1461_v10  ;;  %v193_v25 = vadd.s32 192, %v1450_v3  ;;  %v488_v11 = vld [vmem:[#allocation9 + $0x18] sm:$0xff]  ;;  %v817_v46 = vld [vmem:[#allocation12] sm:$0xff] }
  0x5c   :  { %1010 = vmatpush1.msk.msra.mxu1 %vm210_vm6, %v1345_v9  ;;  %1093 = vmatprep.subr.msk.mxu0 %vm153_vm10, %v1345_v9  ;;  %vm148_vm6 = vcmp.eq.s32.totalorder %v131_v20, %v1461_v10  ;;  %v192_v26 = vadd.s32 184, %v1450_v3  ;;  %v191_v28 = vadd.s32 176, %v1450_v3  ;;  %v190_v30 = vadd.s32 168, %v1450_v3  ;;  %v720_v12 = vld [vmem:[%s1682_s7] sm:$0xff] }
  0x5d   :  { %408 = vmatprep.subr.mxu1 %v1344_v2  ;;  %1094 = vmatpush3.msk.msra.mxu0 %vm153_vm10, %v1345_v9  ;;  %vm146_vm10 = vcmp.eq.s32.totalorder %v129_v22, %v1461_v10  ;;  %v189_v32 = vadd.s32 160, %v1450_v3  ;;  %v188_v33 = vadd.s32 152, %v1450_v3  ;;  %v187_v34 = vadd.s32 144, %v1450_v3 }
  0x5e   :  { %1011 = vmatpush1.msk.msra.mxu1 %vm209_vm9, %v1345_v9  ;;  %1095 = vmatprep.subr.msk.mxu0 %vm152_vm12, %v1345_v9  ;;  %vm202_vm9 = vcmp.eq.s32.totalorder %v130_v21, %v1455_v7  ;;  %v186_v35 = vadd.s32 136, %v1450_v3  ;;  %v185_v36 = vadd.s32 128, %v1450_v3 }
  0x5f   :  { %410 = vmatprep.subr.mxu1 %v1344_v2  ;;  %1096 = vmatpush3.msk.msra.mxu0 %vm152_vm12, %v1345_v9  ;;  %vm145_vm12 = vcmp.eq.s32.totalorder %v128_v23, %v1461_v10 }
  0x60   :  { %1012 = vmatpush1.msk.msra.mxu1 %vm208_vm11, %v1345_v9  ;;  %1097 = vmatprep.subr.msk.mxu0 %vm151_vm14, %v1345_v9  ;;  %vm201_vm11 = vcmp.eq.s32.totalorder %v129_v22, %v1455_v7 }
  0x61   :  { %412 = vmatprep.subr.mxu1 %v1344_v2  ;;  %1098 = vmatpush3.msk.msra.mxu0 %vm151_vm14, %v1345_v9  ;;  %vm144_vm14 = vcmp.eq.s32.totalorder %v127_v24, %v1461_v10 }
  0x62   :  { %1013 = vmatpush1.msk.msra.mxu1 %vm207_vm13, %v1345_v9  ;;  %1099 = vmatprep.subr.msk.mxu0 %vm150_vm0, %v1345_v9  ;;  %vm200_vm13 = vcmp.eq.s32.totalorder %v128_v23, %v1455_v7 }
  0x63   :  { %414 = vmatprep.subr.mxu1 %v1344_v2  ;;  %1100 = vmatpush3.msk.msra.mxu0 %vm150_vm0, %v1345_v9  ;;  %vm143_vm0 = vcmp.eq.s32.totalorder %v1450_v3, %v1461_v10  ;;  %v487_v10 = vld [vmem:[#allocation9 + $0x10] sm:$0xff] }
  0x64   :  { %1014 = vmatpush1.msk.msra.mxu1 %vm206_vm15, %v1345_v9  ;;  %1101 = vmatprep.subr.msk.mxu0 %vm149_vm3, %v1345_v9  ;;  %vm199_vm15 = vcmp.eq.s32.totalorder %v127_v24, %v1455_v7 }
  0x65   :  { %416 = vmatprep.subr.mxu1 %v1344_v2  ;;  %1102 = vmatpush3.msk.msra.mxu0 %vm149_vm3, %v1345_v9  ;;  %vm222_vm3 = vcmp.eq.s32.totalorder %v193_v25, %v1455_v7 }
  0x66   :  { %1015 = vmatpush1.msk.msra.mxu1 %vm205_vm1, %v1345_v9  ;;  %1103 = vmatprep.subr.msk.mxu0 %vm148_vm6, %v1345_v9  ;;  %vm198_vm1 = vcmp.eq.s32.totalorder %v1450_v3, %v1455_v7 }
  0x67   :  { %418 = vmatprep.subr.mxu1 %v1344_v2  ;;  %1104 = vmatpush3.msk.msra.mxu0 %vm148_vm6, %v1345_v9  ;;  %vm220_vm6 = vcmp.eq.s32.totalorder %v191_v28, %v1455_v7 }
  0x68   :  { %1016 = vmatpush1.msk.msra.mxu1 %vm204_vm5, %v1345_v9  ;;  %1105 = vmatprep.subr.msk.mxu0 %vm147_vm8, %v1345_v9  ;;  %vm221_vm5 = vcmp.eq.s32.totalorder %v192_v26, %v1455_v7 }
  0x69   :  { %420 = vmatprep.subr.mxu1 %v1344_v2  ;;  %1106 = vmatpush3.msk.msra.mxu0 %vm147_vm8, %v1345_v9  ;;  %vm218_vm8 = vcmp.eq.s32.totalorder %v189_v32, %v1455_v7 }
  0x6a   :  { %1017 = vmatpush1.msk.msra.mxu1 %vm203_vm7, %v1345_v9  ;;  %1107 = vmatprep.subr.msk.mxu0 %vm146_vm10, %v1345_v9  ;;  %vm219_vm7 = vcmp.eq.s32.totalorder %v190_v30, %v1455_v7 }
  0x6b   :  { %422 = vmatprep.subr.mxu1 %v1344_v2  ;;  %1108 = vmatpush3.msk.msra.mxu0 %vm146_vm10, %v1345_v9  ;;  %vm215_vm10 = vcmp.eq.s32.totalorder %v186_v35, %v1455_v7 }
  0x6c   :  { %1018 = vmatpush1.msk.msra.mxu1 %vm202_vm9, %v1345_v9  ;;  %1109 = vmatprep.subr.msk.mxu0 %vm145_vm12, %v1345_v9  ;;  %vm217_vm9 = vcmp.eq.s32.totalorder %v188_v33, %v1455_v7 }
  0x6d   :  { %424 = vmatprep.subr.mxu1 %v1344_v2  ;;  %1110 = vmatpush3.msk.msra.mxu0 %vm145_vm12, %v1345_v9  ;;  %vm493_vm12 = vcmask 261120  }
  0x6e   :  { %1019 = vmatpush1.msk.msra.mxu1 %vm201_vm11, %v1345_v9  ;;  %1111 = vmatprep.subr.msk.mxu0 %vm144_vm14, %v1345_v9  ;;  %vm214_vm11 = vcmp.eq.s32.totalorder %v185_v36, %v1455_v7 }
  0x6f   :  { %426 = vmatprep.subr.mxu1 %v1344_v2  ;;  %1112 = vmatpush3.msk.msra.mxu0 %vm144_vm14, %v1345_v9 }
  0x70   :  { %1020 = vmatpush1.msk.msra.mxu1 %vm200_vm13, %v1345_v9  ;;  %1113 = vmatprep.subr.msk.mxu0 %vm143_vm0, %v1345_v9  ;;  %vm824_vm13 = vcmask 130048  }
  0x71   :  { %428 = vmatprep.subr.mxu1 %v1344_v2  ;;  %1114 = vmatpush3.msk.msra.mxu0 %vm143_vm0, %v1345_v9 }
  0x72   :  { %1021 = vmatpush1.msk.msra.mxu1 %vm199_vm15, %v1345_v9  ;;  %1116 = vmatmul.mubr.msk.f32.vlgmr.msra.gmra.mxu0 %vm277_vm4, %v274_v27 }
  0x73   :  { %430 = vmatprep.subr.mxu1 %v1344_v2  ;;  %1118 = vmatprep.mubr.msk.f32.mxu0 %vm277_vm4, %v275_v29 }
  0x74   :  { %1022 = vmatpush1.msk.msra.mxu1 %vm198_vm1, %v1345_v9  ;;  %699 = vperm.xlu1 %1181, %v689_v47  }
  0x75   :  { %446 = vmatprep.subr.mxu1 %v1344_v2  ;;  %704 = vperm.xlu0 %1180, %v690_v48  }
  0x76   :  { %1023 = vmatpush2.msk.msra.mxu1 %vm222_vm3, %v1345_v9  ;;  %1119 = vmatmul.mubr.msk.f32.gmra.mxu0 %vm277_vm4, %v276_v31  ;;  %vm216_vm4 = vcmp.eq.s32.totalorder %v187_v34, %v1455_v7  ;;  %v492_v7 = vld [vmem:[#allocation11 + $0x18] sm:$0xff] }
  0x77   :  { %448 = vmatprep.subr.mxu1 %v1344_v2  ;;  %1129 = vmatprep.mubr.msk.f32.mxu0 %vm493_vm12, %v489_v44 }
  0x78   :  { %1024 = vmatpush2.msk.msra.mxu1 %vm221_vm5, %v1345_v9  ;;  %694 = vperm.xlu1 %1181, %v688_v49  }
  0x79   :  { %450 = vmatprep.subr.mxu1 %v1344_v2  ;;  %731 = vperm.xlu0 %1180, %v723_v50  }
  0x7a   :  { %1025 = vmatpush2.msk.msra.mxu1 %vm220_vm6, %v1345_v9 }
  0x7b   :  { %452 = vmatprep.subr.mxu1 %v1344_v2 }
  0x7c   :  { %1026 = vmatpush2.msk.msra.mxu1 %vm219_vm7, %v1345_v9  ;;  %726 = vperm.xlu1 %1181, %v722_v51  }
  0x7d   :  { %454 = vmatprep.subr.mxu1 %v1344_v2  ;;  %821 = vperm.xlu0 %1180, %v818_v52  }
  0x7e   :  { %1027 = vmatpush2.msk.msra.mxu1 %vm218_vm8, %v1345_v9 }
  0x7f   :  { %456 = vmatprep.subr.mxu1 %v1344_v2 }
  0x80   :  { %1028 = vmatpush2.msk.msra.mxu1 %vm217_vm9, %v1345_v9  ;;  %902 = vperm.xlu1 %1181, %v899_v53  }
  0x81   :  { %458 = vmatprep.subr.mxu1 %v1344_v2  ;;  %915 = vperm.xlu0 %1180, %v912_v54  }
  0x82   :  { %1029 = vmatpush2.msk.msra.mxu1 %vm216_vm4, %v1345_v9 }
  0x83   :  { %460 = vmatprep.subr.mxu1 %v1344_v2 }
  0x84   :  { %1030 = vmatpush2.msk.msra.mxu1 %vm215_vm10, %v1345_v9 }
  0x85   :  { %462 = vmatprep.subr.mxu1 %v1344_v2 }
  0x86   :  { %1031 = vmatpush2.msk.msra.mxu1 %vm214_vm11, %v1345_v9  ;;  %v486_v9 = vld [vmem:[#allocation9 + $0x8] sm:$0xff] }
  0x87   :  { %465 = vmatmul.mubr.f32.vlgmr.msra.gmra.mxu1 %v379_v37  ;;  %v721_v37 = vld [vmem:[%s1682_s7 + $0x8] sm:$0xff]  ;;  %s1348_s7 = smov [#allocation14]  }
  0x88   :  { %1033 = vmatprep.mubr.msk.f32.mxu1 %vm387_vm2, %v382_v38  ;;  %s938_s25 = sshll.u32 %s1348_s7, 4  ;;  %s939_s25 = int_to_ptr.vmem [resolvable:$true] %s938_s25 }
  0x89   :  { %s1306_s26 = scalar_lea.vmem %s939_s25, 16  ;;  %s1310_s27 = scalar_lea.vmem %s939_s25, 32 }
  0x8a   :  { %p1307_p2 = scmp.ne.s32.totalorder %s939_s25, %s1306_s26  ;;  %p1311_p3 = scmp.lt.s32.totalorder %s939_s25, %s939_s25 }
  0x8b   :  { %470 = vmatmul.mubr.f32.gmra.mxu1 %v381_v39  ;;  %p1312_p4 = scmp.lt.s32.totalorder %s1310_s27, %s1306_s26 }
  0x8c   :  { %1034 = vmatprep.mubr.msk.f32.mxu1 %vm387_vm2, %v384_v40 }
  0x8d   :  { %p1313_p5 = por %p1312_p4, %p1311_p3 }
  0x8f   :  { %475 = vmatmul.mubr.f32.gmra.mxu1 %v383_v41  ;;  %p1314_p6 = pnand %p1313_p5, %p1307_p2 }
  0x90   :  { %1035 = vmatprep.mubr.msk.f32.mxu1 %vm387_vm2, %v386_v42  ;;  %vm1347_vm2 = vmmov 0  }
  0x93   :  { %480 = vmatmul.mubr.f32.gmra.mxu1 %v385_v43 }
  0xd2   :  { %v710_v18 = vpop.permute.xlu0 %709 }
  0xef   :  { %v700_v20 = vpop.permute.xlu1 %699 }
  0xf0   :  { %v705_v28 = vpop.permute.xlu0 %704 }
  0xf3   :  { %v695_v32 = vpop.permute.xlu1 %694 }
  0xf4   :  { %v732_v38 = vpop.permute.xlu0 %731 }
  0xf7   :  { %v727_v41 = vpop.permute.xlu1 %726 }
  0xf8   :  { %v822_v47 = vpop.permute.xlu0 %821 }
  0xfb   :  { %v903_v52 = vpop.permute.xlu1 %902 }
 0x132   :  { %v1117_v61 = vpop.f32.mrf.mxu0 }
 0x134   :  { %v360_v0 = vpop.f32.mrf.mxu0 }
 0x136   :  { %v1120_v1 = vpop.f32.mrf.mxu0 }
 0x138   :  { %v370_v6 = vpop.f32.mrf.mxu0 }
 0x147   :  { %v466_v55 = vpop.f32.mrf.mxu1 }
 0x149   :  { %v468_v56 = vpop.f32.mrf.mxu1 }
 0x14b   :  { %v471_v57 = vpop.f32.mrf.mxu1 }
 0x14d   :  { %v473_v58 = vpop.f32.mrf.mxu1 }
 0x14f   :  { %v476_v59 = vpop.f32.mrf.mxu1 }
 0x151   :  { %v478_v60 = vpop.f32.mrf.mxu1 }
 0x153   :  { %v481_v62 = vpop.f32.mrf.mxu1 }
 0x154   :  { %1121 = vmatprep.subr.mxu0 %v481_v62 }
 0x155   :  { %v483_v63 = vpop.f32.mrf.mxu1  ;;  %1122 = vmatpush3.msra.mxu0 %v481_v62 }
 0x156   :  { %1123 = vmatprep.subr.mxu0 %v476_v59 }
 0x157   :  { %1124 = vmatpush3.msra.mxu0 %v476_v59  ;;  %v916_v59 = vpop.permute.xlu0 %915 }
 0x158   :  { %1125 = vmatprep.subr.mxu0 %v471_v57 }
 0x159   :  { %1126 = vmatpush3.msra.mxu0 %v471_v57  ;;  %v920_v57 = vsub.s32 0, %v1450_v3 }
 0x15a   :  { %1127 = vmatprep.subr.mxu0 %v466_v55 }
 0x15b   :  { %1128 = vmatpush3.msra.mxu0 %v466_v55 }
 0x15c   :  { %1130 = vmatmul.mubr.msk.f32.vlgmr.msra.gmra.mxu0 %vm493_vm12, %v490_v4  ;;  %1135 = vmatprep.subr.mxu0 %v1120_v1 }
 0x15d   :  { %1136 = vmatpush3.msra.mxu0 %v1120_v1  ;;  %1132 = vmatprep.mubr.msk.f32.mxu0 %vm493_vm12, %v491_v5 }
 0x15e   :  { %1137 = vmatprep.subr.mxu0 %v370_v6 }
 0x15f   :  { %1138 = vmatpush3.msra.mxu0 %v370_v6 }
 0x160   :  { %1133 = vmatmul.mubr.msk.f32.gmra.mxu0 %vm493_vm12, %v492_v7  ;;  %1139 = vmatprep.subr.mxu0 %v1117_v61 }
 0x161   :  { %1140 = vmatpush3.msra.mxu0 %v1117_v61  ;;  %1143 = vmatprep.mubr.msk.f32.mxu0 %vm493_vm12, %v485_v8  ;;  %v921_v61 = vrot.slane %v916_v59, %v920_v57 }
 0x162   :  { %1141 = vmatprep.subr.mxu0 %v360_v0 }
 0x163   :  { %1142 = vmatpush3.msra.mxu0 %v360_v0 }
 0x164   :  { %1144 = vmatmul.mubr.msk.f32.vlgmr.msra.gmra.mxu0 %vm493_vm12, %v486_v9 }
 0x165   :  { %1146 = vmatprep.mubr.msk.f32.mxu0 %vm493_vm12, %v487_v10 }
 0x168   :  { %1147 = vmatmul.mubr.msk.f32.gmra.mxu0 %vm493_vm12, %v488_v11 }
 0x169   :  { %1157 = vmatprep.mubr.msk.f32.mxu0 %vm493_vm12, %v720_v12 }
 0x21c   :  { %v1131_v13 = vpop.f32.mrf.mxu0 }
 0x21e   :  { %v572_v14 = vpop.f32.mrf.mxu0 }
 0x220   :  { %v1134_v15 = vpop.f32.mrf.mxu0 }
 0x222   :  { %v582_v16 = vpop.f32.mrf.mxu0 }
 0x224   :  { %v1145_v17 = vpop.f32.mrf.mxu0 }
 0x225   :  { %v675_v22 = vadd.f32 %v1145_v17, %v1131_v13 }
 0x226   :  { %v669_v19 = vpop.f32.mrf.mxu0 }
 0x227   :  { %v670_v25 = vadd.f32 %v669_v19, %v572_v14  ;;  %v713_v29 = vadd.f32 %v700_v20, %v675_v22 }
 0x228   :  { %v1148_v21 = vpop.f32.mrf.mxu0 }
 0x229   :  { %v685_v23 = vadd.f32 %v1148_v21, %v1134_v15  ;;  %v712_v33 = vadd.f32 %v695_v32, %v670_v25  ;;  %v717_v35 = vmax.f32 %v713_v29, 0.0 }
 0x22a   :  { %v679_v24 = vpop.f32.mrf.mxu0 }
 0x22b   :  { %v715_v26 = vadd.f32 %v710_v18, %v685_v23  ;;  %v680_v27 = vadd.f32 %v679_v24, %v582_v16  ;;  %v716_v36 = vmax.f32 %v712_v33, 0.0 }
 0x22d   :  { %v719_v30 = vmax.f32 %v715_v26, 0.0  ;;  %v714_v31 = vadd.f32 %v705_v28, %v680_v27 }
 0x22f   :  { %v718_v34 = vmax.f32 %v714_v31, 0.0  ;;  %1149 = vmatprep.subr.mxu0 %v719_v30 }
 0x230   :  { %1150 = vmatpush3.msra.mxu0 %v719_v30 }
 0x231   :  { %1151 = vmatprep.subr.mxu0 %v718_v34 }
 0x232   :  { %1152 = vmatpush3.msra.mxu0 %v718_v34 }
 0x233   :  { %1153 = vmatprep.subr.mxu0 %v717_v35 }
 0x234   :  { %1154 = vmatpush3.msra.mxu0 %v717_v35 }
 0x235   :  { %1155 = vmatprep.subr.mxu0 %v716_v36 }
 0x236   :  { %1156 = vmatpush3.msra.mxu0 %v716_v36 }
 0x237   :  { %1158 = vmatmul.mubr.msk.f32.vlgmr.msra.gmra.mxu0 %vm493_vm12, %v721_v37  ;;  %1160 = vmatprep.subr.mxu0 %v1344_v2 }
 0x238   :  { %1164 = vmatprep.mubr.msk.f32.mxu0 %vm1347_vm2, %v1344_v2 }
 0x2f7   :  { %v1159_v39 = vpop.f32.mrf.mxu0 }
 0x2f8   :  { %v812_v40 = vadd.f32 %v1159_v39, %v732_v38 }
 0x2f9   :  { %v806_v42 = vpop.f32.mrf.mxu0 }
 0x2fa   :  { %v816_v43 = vmax.f32 %v812_v40, 0.0  ;;  %v807_v44 = vadd.f32 %v806_v42, %v727_v41 }
 0x2fc   :  { %v815_v45 = vmax.f32 %v807_v44, 0.0  ;;  %1161 = vmatpush3.msra.mxu0 %v816_v43 }
 0x2fd   :  { %1162 = vmatprep.subr.mxu0 %v1344_v2 }
 0x2fe   :  { %1163 = vmatpush3.msra.mxu0 %v815_v45 }
 0x2ff   :  { %1165 = vmatmul.mubr.msk.f32.vlgmr.msra.gmra.mxu0 %vm824_vm13, %v817_v46 }
 0x3bf   :  { %v894_v48 = vpop.f32.mrf.mxu0 }
 0x3c0   :  { %v895_v49 = vadd.f32 %v894_v48, %v822_v47 }
 0x3c1   :  { %v1166_v50 = vpop.f32.mrf.mxu0 }
 0x3c2   :  { %v898_v51 = vmax.f32 %v895_v49, 0.0 }
 0x3c4   :  { %v905_v53 = vmul.f32 %v903_v52, %v898_v51 }
 0x3c6   :  { %v906_v54 = vrot.slane %v905_v53, 4 }
 0x3c8   :  { %v907_v55 = vadd.f32 %v906_v54, %v905_v53 }
 0x3ca   :  { %v908_v56 = vrot.slane %v907_v55, 2 }
 0x3cc   :  { %v909_v58 = vadd.f32 %v908_v56, %v907_v55 }
 0x3ce   :  { %v910_v60 = vrot.slane %v909_v58, 1 }
 0x3d0   :  { %v911_v62 = vadd.f32 %v910_v60, %v909_v58 }
 0x3d2   :  { %v922_v2 = vadd.f32 %v921_v61, %v911_v62 }
 0x3d4   :  { %v923_v63 = vsub.f32 0.0, %v922_v2 }
 0x3d6   :  { %v924_v0 = vmul.f32 1.442695, %v923_v63 }
 0x3d8   :  { %1182 = vpow2.f32 %v924_v0 }
 0x3e5   :  { %v1183_v1 = vpop.eup %1182 }
 0x3e6   :  { %v926_v4 = vadd.f32 1.0, %v1183_v1 }
 0x3e8   :  { %1184 = vrcp.f32 %v926_v4 }
 0x3f5   :  { %v1185_v5 = vpop.eup %1184 }
 0x3f6   :  { %v929_v6 = vmul.f32 5.0, %v1185_v5 }
 0x3f8   :  { %v930_v7 = vadd.f32 1.0, %v929_v6 }
 0x3fa   :  { %931 = vst [vmem:[#allocation14] sm:$0x1] %v930_v7 }
 0x3fb   :  { %1317 = shalt.err (!%p1314_p6)
}
 0x3fc   :  { %941 = dma.vmem_to_hbm [thread:$0]  %s939_s25, 16, %s1688_s13, [#allocation5]  }
 0x3fd   :  { %1334 = dma.done.wait [#allocation5], 16  }
 0x3fe   :  { %1335 = vsyncadd [#allocation5], 4294967280 }
 0x3ff   :  { %945 = vsyncpa [#allocation4], 1 }
 0x400   :  { %946 = vsyncpa [#allocation7], 1 }
 0x401   :  { %947 = vsyncpa [#allocation10], 1 }
 0x402   :  { %948 = vsyncpa [#allocation13], 1 }
 0x403   :  { %949 = vsyncpa [#allocation5], 1 }

</bundles_post_ra>
